<compile_context>
chip_gen: v6e
topology: v6e:2x2x1
jax: 0.10.0
libtpu: 0.0.40
codegen_flags: <defaults>
</compile_context>

<pallas_src>
import functools
import math

import jax
import jax.numpy as jnp
from jax import lax
from jax.experimental import pallas as pl
from jax.experimental.pallas import tpu as pltpu


def _round_up(x: int, m: int) -> int:
    return (x + m - 1) // m * m


def _choose_tile_n(n: int, c: int) -> int:
    """Rows per tile: multiple of 8, <=1024, ~12 live f32 (tile_n, C) temporaries <= ~8 MiB."""
    budget_rows = (8 * 1024 * 1024) // (12 * 4 * max(c, 1))
    tile = min(1024, max(8, budget_rows), _round_up(n, 8))
    return max(8, (tile // 8) * 8)


def _loss_rlb_kernel(scores_ref, labels_ref, out_ref, *,
                     n_rows: int, tile_n: int, t_lb: float):
    i = pl.program_id(0)

    @pl.when(i == 0)
    def _init():
        out_ref[...] = jnp.zeros_like(out_ref)

    s = scores_ref[...].astype(jnp.float32)          # (tile_n, C), cast on VPU
    y = labels_ref[...]                               # (tile_n, 1) int32
    tn, c = s.shape

    # Rows added by the (possibly ragged) last grid block contain unspecified data;
    # they are removed with selects only, so NaN/inf garbage never propagates.
    row = i * tile_n + lax.broadcasted_iota(jnp.int32, (tn, 1), 0)
    row_valid = row < n_rows                          # (tn, 1) bool

    # ---------------- Cross-entropy (sum over valid rows) ----------------
    m = jnp.max(s, axis=1, keepdims=True)
    z = s - m
    lse = jnp.log(jnp.sum(jnp.exp(z), axis=1, keepdims=True))
    col = lax.broadcasted_iota(jnp.int32, (tn, c), 1)
    picked = jnp.sum(jnp.where(col == y, z, 0.0), axis=1, keepdims=True)   # z[i, y_i]
    ce_rows = jnp.where(row_valid, lse - picked, 0.0)                      # (tn, 1)

    # ---------------- Rectified log-barrier (sum over valid rows) ----------------
    seeleft = s[:, :c - 1] - s[:, 1:]                 # col j: s[:, j] - s[:, j+1]
    colm = lax.broadcasted_iota(jnp.int32, (tn, c - 1), 1)
    diff = jnp.where(colm < y, seeleft, -seeleft)

    # Scalar constants folded at trace time (no per-tile EUP/VALU work for them).
    t = float(t_lb)
    inv_t = 1.0 / t
    ct = -(inv_t * inv_t)
    c_great = 2.0 * inv_t * math.log(t) + inv_t       # == -(1/t) log(1/t^2) + 1/t

    is_less = diff <= ct
    safe_neg = jnp.where(is_less, -diff, 1.0)         # keep log() well defined
    phi = jnp.where(is_less, -inv_t * jnp.log(safe_neg), t * diff + c_great)
    phi = jnp.maximum(phi, 0.0)                       # ReLU rectifier
    rlb = jnp.where(row_valid, phi, 0.0)              # (tn, c-1)

    partial = (jnp.sum(ce_rows, axis=0, keepdims=True)
               + jnp.sum(jnp.sum(rlb, axis=1, keepdims=True), axis=0, keepdims=True))
    out_ref[...] += partial                           # resident (1,1) accumulator

    @pl.when(i == pl.num_programs(0) - 1)
    def _finalize():
        out_ref[...] *= jnp.float32(1.0 / n_rows)


def loss_rlb(scores, labels, *, init_t: float = 1.0, tile_n: int | None = None):
    """scores: (N, C) float (any float dtype), labels: (N,) int. Returns scalar f32 loss."""
    n, c = scores.shape
    assert c > 1, "Number of classes must be > 1"
    assert float(init_t) > 0.0

    if tile_n is None:
        tile_n = _choose_tile_n(n, c)
    assert tile_n % 8 == 0 and tile_n > 0
    num_tiles = pl.cdiv(n, tile_n)

    labels2d = labels.astype(jnp.int32).reshape(n, 1)
    kernel = functools.partial(_loss_rlb_kernel, n_rows=n, tile_n=tile_n,
                               t_lb=float(init_t))

    out = pl.pallas_call(
        kernel,
        out_shape=jax.ShapeDtypeStruct((1, 1), jnp.float32),
        grid=(num_tiles,),
        in_specs=[
            pl.BlockSpec((tile_n, c), lambda i: (i, 0)),   # last dim == full C (allowed)
            pl.BlockSpec((tile_n, 1), lambda i: (i, 0)),
        ],
        out_specs=pl.BlockSpec((1, 1), lambda i: (0, 0)),
        compiler_params=pltpu.CompilerParams(dimension_semantics=("arbitrary",)),
        cost_estimate=pl.CostEstimate(
            flops=int(12 * n * c),
            transcendentals=int(2 * n * c),
            bytes_accessed=int(n * c * scores.dtype.itemsize + n * 4 + 4),
        ),
    )(scores, labels2d)
    return out[0, 0]


def _loss_rlb_reference(scores, labels, init_t=1.0):
    """Pure-JAX reference mirroring the PyTorch module."""
    s = scores.astype(jnp.float32)
    n, c = s.shape
    # CE
    logp = jax.nn.log_softmax(s, axis=1)
    ce = -jnp.mean(logp[jnp.arange(n), labels])
    # RLB
    seeleft = s[:, :-1] - s[:, 1:]
    jidx = jnp.arange(c - 1)[None, :]
    left_on = (jidx < labels[:, None]).astype(jnp.float32)
    diff = left_on * seeleft + (1.0 - left_on) * (-seeleft)
    t = jnp.float32(init_t)
    ct = -1.0 / (t * t)
    is_less = diff <= ct
    loss_less = -(1.0 / t) * jnp.log(jnp.where(is_less, -diff, 1.0))
    loss_great = t * diff - (1.0 / t) * jnp.log(1.0 / (t * t)) + 1.0 / t
    loss_mtx = jnp.maximum(jnp.where(is_less, loss_less, loss_great), 0.0)
    return ce + jnp.mean(jnp.sum(loss_mtx, axis=1))


if __name__ == "__main__":
    key = jax.random.PRNGKey(0)
    k1, k2, k3, k4 = jax.random.split(key, 4)

    # Case 1: small shapes consistent with the module (n=8 samples, 16 classes).
    N, C = 8, 16
    scores = jax.random.normal(k1, (N, C), dtype=jnp.float32) * 2.0
    labels = jax.random.randint(k2, (N,), 0, C, dtype=jnp.int32)
    out = jax.block_until_ready(loss_rlb(scores, labels, init_t=1.0))
    ref = _loss_rlb_reference(scores, labels, init_t=1.0)
    assert jnp.isfinite(out), f"non-finite loss: {out}"
    assert jnp.allclose(out, ref, rtol=1e-5, atol=1e-5), f"mismatch: {out} vs {ref}"

    # Case 2: multi-tile grid, ragged last row block, non-power-of-two class count.
    N2, C2 = 100, 10
    scores2 = jax.random.normal(k3, (N2, C2), dtype=jnp.float32) * 2.0
    labels2 = jax.random.randint(k4, (N2,), 0, C2, dtype=jnp.int32)
    out2 = jax.block_until_ready(loss_rlb(scores2, labels2, init_t=1.0, tile_n=16))
    ref2 = _loss_rlb_reference(scores2, labels2, init_t=1.0)
    assert jnp.isfinite(out2), f"non-finite loss: {out2}"
    # Slightly looser tolerance: per-tile accumulation order differs from the reference.
    assert jnp.allclose(out2, ref2, rtol=1e-4, atol=1e-4), f"mismatch: {out2} vs {ref2}"

    print("KERNEL_OK")
</pallas_src>

<mosaic_0001>
module attributes {stable_mosaic.version = 11 : i64} {
  func.func @_loss_rlb_kernel(%arg0: i32, %arg1: memref<8x16xf32, #tpu.memory_space<vmem>>, %arg2: memref<8x1xi32, #tpu.memory_space<vmem>>, %arg3: memref<1x1xf32, #tpu.memory_space<vmem>>) attributes {dimension_semantics = [#tpu.dimension_semantics<arbitrary>], iteration_bounds = array<i64: 1>, scalar_prefetch = 0 : i64, scratch_operands = 0 : i64, tpu.core_type = #tpu.core_type<tc>, window_params = [{transform_indices = @transform_0, window_bounds = array<i64: 8, 16>}, {transform_indices = @transform_1, window_bounds = array<i64: 8, 1>}, {pipeline_mode = #tpu.pipeline_mode<synchronous>, transform_indices = @transform_2, window_bounds = array<i64: 1, 1>}]} {
    %c0_i32 = arith.constant 0 : i32
    %0 = arith.cmpi eq, %arg0, %c0_i32 : i32
    %1 = arith.extui %0 : i1 to i32
    %c0_i32_0 = arith.constant 0 : i32
    %2 = arith.cmpi ne, %1, %c0_i32_0 : i32
    scf.if %2 {
      %cst_27 = arith.constant 0.000000e+00 : f32
      %71 = vector.broadcast %cst_27 : f32 to vector<1x1xf32>
      %c0_28 = arith.constant 0 : index
      %c0_29 = arith.constant 0 : index
      %72 = vector.load %arg3[%c0_28, %c0_29] : memref<1x1xf32, #tpu.memory_space<vmem>>, vector<1x1xf32>
      tpu.vector_store %arg3[%c0_28, %c0_29], %71 {strides = array<i32>} : memref<1x1xf32, #tpu.memory_space<vmem>>, vector<1x1xf32>,
    } else {
    }
    %c0 = arith.constant 0 : index
    %c0_1 = arith.constant 0 : index
    %3 = vector.load %arg1[%c0, %c0_1] : memref<8x16xf32, #tpu.memory_space<vmem>>, vector<8x16xf32>
    %c0_2 = arith.constant 0 : index
    %c0_3 = arith.constant 0 : index
    %4 = vector.load %arg2[%c0_2, %c0_3] : memref<8x1xi32, #tpu.memory_space<vmem>>, vector<8x1xi32>
    %c8_i32 = arith.constant 8 : i32
    %5 = arith.muli %arg0, %c8_i32 : i32
    %6 = tpu.iota {dimensions = array<i32: 0>} : vector<8x1xi32>
    %7 = vector.broadcast %5 : i32 to vector<8x1xi32>
    %8 = arith.addi %7, %6 : vector<8x1xi32>
    %c8_i32_4 = arith.constant 8 : i32
    %9 = vector.broadcast %c8_i32_4 : i32 to vector<8x1xi32>
    %10 = arith.cmpi slt, %8, %9 : vector<8x1xi32>
    %cst = arith.constant dense<0xFF800000> : vector<8xf32>
    %11 = vector.multi_reduction <maximumf>, %3, %cst [1] : vector<8x16xf32> to vector<8xf32>
    %12 = vector.shape_cast %11 : vector<8xf32> to vector<8x1xf32>
    %13 = vector.broadcast %12 : vector<8x1xf32> to vector<8x16xf32>
    %14 = arith.subf %3, %13 : vector<8x16xf32>
    %15 = math.exp %14 : vector<8x16xf32>
    %cst_5 = arith.constant dense<0.000000e+00> : vector<8xf32>
    %16 = vector.multi_reduction <add>, %15, %cst_5 [1] : vector<8x16xf32> to vector<8xf32>
    %17 = vector.shape_cast %16 : vector<8xf32> to vector<8x1xf32>
    %18 = math.log %17 : vector<8x1xf32>
    %19 = tpu.iota {dimensions = array<i32: 1>} : vector<8x16xi32>
    %20 = vector.broadcast %4 : vector<8x1xi32> to vector<8x16xi32>
    %21 = arith.cmpi eq, %19, %20 : vector<8x16xi32>
    %cst_6 = arith.constant 0.000000e+00 : f32
    %22 = vector.broadcast %cst_6 : f32 to vector<8x16xf32>
    %23 = arith.select %21, %14, %22 : vector<8x16xi1>, vector<8x16xf32>
    %cst_7 = arith.constant dense<0.000000e+00> : vector<8xf32>
    %24 = vector.multi_reduction <add>, %23, %cst_7 [1] : vector<8x16xf32> to vector<8xf32>
    %25 = vector.shape_cast %24 : vector<8xf32> to vector<8x1xf32>
    %26 = arith.subf %18, %25 : vector<8x1xf32>
    %cst_8 = arith.constant 0.000000e+00 : f32
    %27 = vector.broadcast %cst_8 : f32 to vector<8x1xf32>
    %28 = arith.select %10, %26, %27 : vector<8x1xi1>, vector<8x1xf32>
    %29 = vector.extract_strided_slice %3 {offsets = [0, 0], sizes = [8, 15], strides = [1, 1]} : vector<8x16xf32> to vector<8x15xf32>
    %30 = vector.extract_strided_slice %3 {offsets = [0, 1], sizes = [8, 15], strides = [1, 1]} : vector<8x16xf32> to vector<8x15xf32>
    %31 = arith.subf %29, %30 : vector<8x15xf32>
    %32 = tpu.iota {dimensions = array<i32: 1>} : vector<8x15xi32>
    %33 = vector.broadcast %4 : vector<8x1xi32> to vector<8x15xi32>
    %34 = arith.cmpi slt, %32, %33 : vector<8x15xi32>
    %cst_9 = arith.constant 0.000000e+00 : f32
    %35 = vector.broadcast %cst_9 : f32 to vector<8x15xf32>
    %36 = arith.subf %35, %31 : vector<8x15xf32>
    %37 = arith.select %34, %31, %36 : vector<8x15xi1>, vector<8x15xf32>
    %cst_10 = arith.constant -1.000000e+00 : f32
    %38 = vector.broadcast %cst_10 : f32 to vector<8x15xf32>
    %39 = arith.cmpf ole, %37, %38 : vector<8x15xf32>
    %cst_11 = arith.constant 0.000000e+00 : f32
    %40 = vector.broadcast %cst_11 : f32 to vector<8x15xf32>
    %41 = arith.subf %40, %37 : vector<8x15xf32>
    %cst_12 = arith.constant 1.000000e+00 : f32
    %42 = vector.broadcast %cst_12 : f32 to vector<8x15xf32>
    %43 = arith.select %39, %41, %42 : vector<8x15xi1>, vector<8x15xf32>
    %44 = math.log %43 : vector<8x15xf32>
    %cst_13 = arith.constant -1.000000e+00 : f32
    %45 = vector.broadcast %cst_13 : f32 to vector<8x15xf32>
    %46 = arith.mulf %45, %44 : vector<8x15xf32>
    %cst_14 = arith.constant 1.000000e+00 : f32
    %47 = vector.broadcast %cst_14 : f32 to vector<8x15xf32>
    %48 = arith.mulf %47, %37 : vector<8x15xf32>
    %cst_15 = arith.constant 1.000000e+00 : f32
    %49 = vector.broadcast %cst_15 : f32 to vector<8x15xf32>
    %50 = arith.addf %48, %49 : vector<8x15xf32>
    %51 = arith.select %39, %46, %50 : vector<8x15xi1>, vector<8x15xf32>
    %cst_16 = arith.constant 0.000000e+00 : f32
    %52 = vector.broadcast %cst_16 : f32 to vector<8x15xf32>
    %53 = arith.maximumf %51, %52 : vector<8x15xf32>
    %cst_17 = arith.constant 0.000000e+00 : f32
    %54 = vector.shape_cast %10 : vector<8x1xi1> to vector<8x1xi1>
    %55 = vector.broadcast %54 : vector<8x1xi1> to vector<8x15xi1>
    %56 = vector.broadcast %cst_17 : f32 to vector<8x15xf32>
    %57 = arith.select %55, %53, %56 : vector<8x15xi1>, vector<8x15xf32>
    %cst_18 = arith.constant dense<0.000000e+00> : vector<1xf32>
    %58 = vector.multi_reduction <add>, %28, %cst_18 [0] : vector<8x1xf32> to vector<1xf32>
    %59 = vector.shape_cast %58 : vector<1xf32> to vector<1x1xf32>
    %cst_19 = arith.constant dense<0.000000e+00> : vector<8xf32>
    %60 = vector.multi_reduction <add>, %57, %cst_19 [1] : vector<8x15xf32> to vector<8xf32>
    %61 = vector.shape_cast %60 : vector<8xf32> to vector<8x1xf32>
    %cst_20 = arith.constant dense<0.000000e+00> : vector<1xf32>
    %62 = vector.multi_reduction <add>, %61, %cst_20 [0] : vector<8x1xf32> to vector<1xf32>
    %63 = vector.shape_cast %62 : vector<1xf32> to vector<1x1xf32>
    %64 = arith.addf %59, %63 : vector<1x1xf32>
    %c0_21 = arith.constant 0 : index
    %c0_22 = arith.constant 0 : index
    %65 = vector.load %arg3[%c0_21, %c0_22] : memref<1x1xf32, #tpu.memory_space<vmem>>, vector<1x1xf32>
    %66 = arith.addf %65, %64 : vector<1x1xf32>
    %c0_23 = arith.constant 0 : index
    %c0_24 = arith.constant 0 : index
    %67 = vector.load %arg3[%c0_23, %c0_24] : memref<1x1xf32, #tpu.memory_space<vmem>>, vector<1x1xf32>
    tpu.vector_store %arg3[%c0_23, %c0_24], %66 {strides = array<i32>} : memref<1x1xf32, #tpu.memory_space<vmem>>, vector<1x1xf32>,
    %c0_i32_25 = arith.constant 0 : i32
    %68 = arith.cmpi eq, %arg0, %c0_i32_25 : i32
    %69 = arith.extui %68 : i1 to i32
    %c0_i32_26 = arith.constant 0 : i32
    %70 = arith.cmpi ne, %69, %c0_i32_26 : i32
    scf.if %70 {
      %c0_27 = arith.constant 0 : index
      %c0_28 = arith.constant 0 : index
      %71 = vector.load %arg3[%c0_27, %c0_28] : memref<1x1xf32, #tpu.memory_space<vmem>>, vector<1x1xf32>
      %cst_29 = arith.constant 1.250000e-01 : f32
      %72 = vector.broadcast %cst_29 : f32 to vector<1x1xf32>
      %73 = arith.mulf %71, %72 : vector<1x1xf32>
      %c0_30 = arith.constant 0 : index
      %c0_31 = arith.constant 0 : index
      %74 = vector.load %arg3[%c0_30, %c0_31] : memref<1x1xf32, #tpu.memory_space<vmem>>, vector<1x1xf32>
      tpu.vector_store %arg3[%c0_30, %c0_31], %73 {strides = array<i32>} : memref<1x1xf32, #tpu.memory_space<vmem>>, vector<1x1xf32>,
    } else {
    }
    return
  }
  func.func @transform_0(%arg0: i32) -> (i32, i32) {
    %c0_i32 = arith.constant 0 : i32
    %c0_i32_0 = arith.constant 0 : i32
    return %arg0, %c0_i32 : i32, i32
  }
  func.func @transform_1(%arg0: i32) -> (i32, i32) {
    %c0_i32 = arith.constant 0 : i32
    %c0_i32_0 = arith.constant 0 : i32
    return %arg0, %c0_i32 : i32, i32
  }
  func.func @transform_2(%arg0: i32) -> (i32, i32) {
    %c0_i32 = arith.constant 0 : i32
    %c0_i32_0 = arith.constant 0 : i32
    %c0_i32_1 = arith.constant 0 : i32
    return %c0_i32, %c0_i32_0 : i32, i32
  }
}

</mosaic_0001>

<bundles_post_ra>
// kernel: tpu_custom_call.1
= control target key start
LH: loop header
LB: loop body
LE: loop exit
PB: predicated region body
PF: predicated region fallthrough
CT: control target
= control target key end

     0   :  { %vm26_vm0 = vcmask 130048   ;;  %v144_v2 = vmov 0   ;;  %s145_s11 = smov 127   ;;  %s178_s0 = inlined_call_operand.vmem [shape: f32[8,16], index: 0, kind: input, shape index: {}]   ;;  %s179_s1 = inlined_call_operand.vmem [shape: s32[8,1], index: 1, kind: input, shape index: {}]   ;;  %s180_s2 = inlined_call_operand.hbm [shape: f32[1,1], index: 2, kind: output, shape index: {}]  }
   0x1   :  { %v18_v0 = vld [vmem:[%s178_s0] sm:$0xff]  ;;  %115 = vset.pattern.permute.xlu0 %v144_v2 }
   0x2   :  { %v27_v1 = vsel %vm26_vm0, %v18_v0, -inf  ;;  %51 = vrot.lane.b32.xlu1 %v18_v0, %s145_s11 }
   0x3   :  { %7 = vsyncpa [#allocation3], 0  ;;  %28 = vmax.xlane.f32.xlu0 %v27_v1  ;;  %v19_v3 = vld [vmem:[%s179_s1] sm:$0xff]  ;;  %v38_v7 = vlaneseq  ;;  %vm76_vm4 = vcmask 121856   ;;  %vm16_vm5 = vcmask 0   ;;  %v146_v27 = vmov 0.0  }
   0x4   :  { %17 = vst.msk [vmem:[#allocation2] sm:$0x1] %vm16_vm5, %v146_v27  ;;  %s147_s0 = smov [#allocation2]  }
   0x5   :  { %v39_v10 = vand.u32 127, %v38_v7  ;;  %s103_s1 = sshll.u32 %s147_s0, 4  ;;  %s104_s1 = int_to_ptr.vmem [resolvable:$true] %s103_s1 }
   0x6   :  { %s122_s14 = scalar_lea.vmem %s104_s1, 16  ;;  %s126_s15 = scalar_lea.vmem %s104_s1, 32 }
   0x7   :  { %p123_p0 = scmp.ne.s32.totalorder %s104_s1, %s122_s14  ;;  %p127_p1 = scmp.lt.s32.totalorder %s104_s1, %s104_s1 }
   0x8   :  { %p128_p2 = scmp.lt.s32.totalorder %s126_s15, %s122_s14 }
   0xa   :  { %p129_p3 = por %p128_p2, %p127_p1 }
   0xb   :  { %v87_v46 = vld [vmem:[#allocation2] sm:$0x1] }
   0xc   :  { %p130_p4 = pnand %p129_p3, %p123_p0 }
  0x19   :  { %41 = vperm.xlu0 %115, %v19_v3  }
  0x74   :  { %v52_v4 = vpop.permute.xlu1 %51 }
  0x75   :  { %v54_v8 = vsub.f32 %v18_v0, %v52_v4 }
  0x77   :  { %v56_v11 = vsub.f32 0.0, %v54_v8 }
  0x8c   :  { %v29_v5 = vpop.xlane.xlu0 %28 }
  0x8d   :  { %v30_v6 = vsub.f32 %v18_v0, %v29_v5 }
  0x8f   :  { %v31_v9 = vmul.f32 1.442695, %v30_v6 }
  0x91   :  { %116 = vpow2.f32 %v31_v9 }
  0x94   :  { %v42_v12 = vpop.permute.xlu0 %41 }
  0x95   :  { %vm55_vm1 = vcmp.lt.s32.totalorder %v39_v10, %v42_v12  ;;  %vm43_vm3 = vcmp.eq.s32.totalorder %v39_v10, %v42_v12 }
  0x96   :  { %v57_v13 = vsel %vm55_vm1, %v54_v8, %v56_v11  ;;  %v44_v18 = vsel %vm43_vm3, %v30_v6, 0.0 }
  0x97   :  { %v59_v14 = vsub.f32 0.0, %v57_v13  ;;  %vm58_vm2 = vcmp.le.f32.partialorder %v57_v13, -1.0  ;;  %v45_v19 = vsel %vm26_vm0, %v44_v18, 0.0  ;;  %v64_v22 = vadd.f32 1.0, %v57_v13 }
  0x99   :  { %v60_v15 = vsel %vm58_vm2, %v59_v14, 1.0 }
  0x9a   :  { %118 = vlog2.f32 %v60_v15 }
  0x9e   :  { %v117_v16 = vpop.eup %116 }
  0x9f   :  { %v33_v17 = vsel %vm26_vm0, %v117_v16, 0.0 }
  0xa0   :  { %34 = vadd.xlane.f32.xlu1 %v33_v17 }
  0xa4   :  { %46 = vadd.xlane.f32.xlu1 %v45_v19 }
  0xa7   :  { %v119_v20 = vpop.eup %118 }
  0xa8   :  { %v62_v21 = vmul.f32 0.6931472, %v119_v20 }
  0xaa   :  { %v63_v23 = vmul.f32 -1.0, %v62_v21 }
  0xac   :  { %v65_v24 = vsel %vm58_vm2, %v63_v23, %v64_v22 }
  0xad   :  { %v66_v25 = vmax.f32 %v65_v24, 0.0 }
  0xaf   :  { %v77_v26 = vsel %vm76_vm4, %v66_v25, 0.0 }
  0xb0   :  { %78 = vadd.xlane.f32.xlu1 %v77_v26 }
 0x129   :  { %v35_v28 = vpop.xlane.xlu1 %34 }
 0x12a   :  { %120 = vlog2.f32 %v35_v28 }
 0x12d   :  { %v47_v29 = vpop.xlane.xlu1 %46 }
 0x137   :  { %v121_v30 = vpop.eup %120 }
 0x138   :  { %v37_v31 = vmul.f32 0.6931472, %v121_v30 }
 0x139   :  { %v79_v32 = vpop.xlane.xlu1 %78 }
 0x13a   :  { %v48_v33 = vsub.f32 %v37_v31, %v47_v29  ;;  %v80_v34 = vrot.slane %v79_v32, 4 }
 0x13c   :  { %v70_v35 = vrot.slane %v48_v33, 4  ;;  %v81_v36 = vadd.f32 %v80_v34, %v79_v32 }
 0x13e   :  { %v71_v37 = vadd.f32 %v70_v35, %v48_v33  ;;  %v82_v38 = vrot.slane %v81_v36, 2 }
 0x140   :  { %v72_v39 = vrot.slane %v71_v37, 2  ;;  %v83_v40 = vadd.f32 %v82_v38, %v81_v36 }
 0x142   :  { %v73_v41 = vadd.f32 %v72_v39, %v71_v37  ;;  %v84_v42 = vrot.slane %v83_v40, 1 }
 0x144   :  { %v74_v43 = vrot.slane %v73_v41, 1  ;;  %v85_v45 = vadd.f32 %v84_v42, %v83_v40 }
 0x146   :  { %v75_v44 = vadd.f32 %v74_v43, %v73_v41 }
 0x148   :  { %v86_v47 = vadd.f32 %v85_v45, %v75_v44 }
 0x14a   :  { %v88_v48 = vadd.f32 %v87_v46, %v86_v47 }
 0x14c   :  { %90 = vst.msk [vmem:[#allocation2] sm:$0x1] %vm16_vm5, %v88_v48 }
 0x153   :  { %v94_v49 = vld [vmem:[#allocation2] sm:$0x1] }
 0x154   :  { %v95_v50 = vmul.f32 0.125, %v94_v49 }
 0x156   :  { %96 = vst.msk [vmem:[#allocation2] sm:$0x1] %vm16_vm5, %v95_v50 }
 0x157   :  { %133 = shalt.err (!%p130_p4)
}
 0x158   :  { %106 = dma.vmem_to_hbm [thread:$0]  %s104_s1, 16, %s180_s2, [#allocation3]  }
 0x159   :  { %142 = dma.done.wait [#allocation3], 16  }
 0x15a   :  { %143 = vsyncadd [#allocation3], 4294967280 }
 0x15b   :  { %110 = vsyncpa [#allocation3], 1 }

</bundles_post_ra>
